<compile_context>
chip_gen: v7x
topology: tpu7x:2x2x1
jax: 0.10.0
libtpu: 0.0.40
codegen_flags: <defaults>
</compile_context>

<pallas_src>
import jax
import jax.numpy as jnp
from jax.experimental import pallas as pl
from jax.experimental.pallas import tpu as pltpu


def _mlp_kernel(xt_ref, w1_ref, b1_ref, w2_ref, b2_ref, w3_ref, b3_ref, o_ref):
    xt = xt_ref[...]                                                  # (D, TB)

    # Layer 1: (H, D) @ (D, TB) -> (H, TB), bias (H, 1) column-broadcast, ReLU
    h1 = jnp.dot(w1_ref[...], xt, preferred_element_type=jnp.float32)
    h1 = jnp.maximum(h1 + b1_ref[...], 0.0)
    if w2_ref.dtype != jnp.float32:
        h1 = h1.astype(w2_ref.dtype)

    # Layer 2: (H, H) @ (H, TB) -> (H, TB), bias + ReLU
    h2 = jnp.dot(w2_ref[...], h1, preferred_element_type=jnp.float32)
    h2 = jnp.maximum(h2 + b2_ref[...], 0.0)
    if w3_ref.dtype != jnp.float32:
        h2 = h2.astype(w3_ref.dtype)

    # Layer 3: (1, H) @ (H, TB) -> (1, TB)  -- lane-dense output slab
    y = jnp.dot(w3_ref[...], h2, preferred_element_type=jnp.float32)
    o_ref[...] = (y + b3_ref[...]).astype(o_ref.dtype)


def _round_up(n, m):
    return ((n + m - 1) // m) * m


def mlp_regressor_forward(x, params, *, block_b=512, matmul_dtype=jnp.float32):
    """x: (B, input_dim) f32. params: PyTorch-layout weights (out,in), biases (out,1).

    block_b: batch tile on the lane axis (rounded to a multiple of 128).
             The per-tile VMEM footprint here is tiny (D, H are small), so the
             default fits comfortably even in v7x's 64 MiB VMEM.
    matmul_dtype: set to jnp.bfloat16 on v6e/v7x to halve x's HBM bytes.
    """
    w1, b1, w2, b2, w3, b3 = (params[k] for k in ("w1", "b1", "w2", "b2", "w3", "b3"))
    B, D = x.shape
    H = w1.shape[0]

    # Pad batch so the lane-axis tile obeys the (8, 128) rule.
    B_pad = _round_up(B, 128)
    tb = min(_round_up(block_b, 128), B_pad)
    B_pad = _round_up(B_pad, tb)
    n_tiles = B_pad // tb

    xt = jnp.transpose(x).astype(matmul_dtype)                        # (D, B)
    if B_pad != B:
        xt = jnp.pad(xt, ((0, 0), (0, B_pad - B)))

    w1c = w1.astype(matmul_dtype)
    w2c = w2.astype(matmul_dtype)
    w3c = w3.astype(matmul_dtype)

    def full(a):
        return pl.BlockSpec(a.shape, lambda i: tuple(0 for _ in a.shape))

    flops = 2 * B_pad * (D * H + H * H + H)
    bytes_accessed = (
        xt.size * xt.dtype.itemsize
        + sum(a.size * a.dtype.itemsize for a in (w1c, b1, w2c, b2, w3c, b3))
        + B_pad * 4
    )

    out = pl.pallas_call(
        _mlp_kernel,
        out_shape=jax.ShapeDtypeStruct((1, B_pad), jnp.float32),
        grid_spec=pltpu.PrefetchScalarGridSpec(
            num_scalar_prefetch=0,
            grid=(n_tiles,),
            in_specs=[
                pl.BlockSpec((D, tb), lambda i: (0, i)),   # x^T streams, double-buffered
                full(w1c), full(b1),                       # resident weights / biases
                full(w2c), full(b2),
                full(w3c), full(b3),
            ],
            out_specs=pl.BlockSpec((1, tb), lambda i: (0, i)),
        ),
        compiler_params=pltpu.CompilerParams(
            dimension_semantics=("parallel",),
        ),
        cost_estimate=pl.CostEstimate(
            flops=flops, transcendentals=0, bytes_accessed=bytes_accessed),
    )(xt, w1c, b1, w2c, b2, w3c, b3)

    return jnp.transpose(out[:, :B])                                  # (B, 1)


def init_params(key, input_dim, hidden_dim=16):
    """PyTorch nn.Linear layout: weights (out_features, in_features), biases (out_features, 1)."""
    k1, k2, k3, k4, k5, k6 = jax.random.split(key, 6)

    def unif(k, shape, fan_in):
        bound = 1.0 / jnp.sqrt(fan_in)
        return jax.random.uniform(k, shape, jnp.float32, -bound, bound)

    return {
        "w1": unif(k1, (hidden_dim, input_dim), input_dim),
        "b1": unif(k2, (hidden_dim, 1), input_dim),
        "w2": unif(k3, (hidden_dim, hidden_dim), hidden_dim),
        "b2": unif(k4, (hidden_dim, 1), hidden_dim),
        "w3": unif(k5, (1, hidden_dim), hidden_dim),
        "b3": unif(k6, (1, 1), hidden_dim),
    }


def mlp_reference(x, p):
    h1 = jnp.maximum(x @ p["w1"].T + p["b1"].T, 0.0)
    h2 = jnp.maximum(h1 @ p["w2"].T + p["b2"].T, 0.0)
    return h2 @ p["w3"].T + p["b3"].T


if __name__ == "__main__":
    key = jax.random.PRNGKey(0)
    kx, kp = jax.random.split(key)

    batch, input_dim, hidden_dim = 8, 8, 16
    x = jax.random.normal(kx, (batch, input_dim), jnp.float32)
    params = init_params(kp, input_dim, hidden_dim)

    out = mlp_regressor_forward(x, params)          # f32 path (exact vs reference)
    out = jax.block_until_ready(out)

    ref = mlp_reference(x, params)
    assert out.shape == (batch, 1)
    assert jnp.allclose(out, ref, atol=1e-5, rtol=1e-5)

    print("KERNEL_OK")
</pallas_src>

<mosaic_0001>
module attributes {stable_mosaic.version = 11 : i64} {
  func.func @_mlp_kernel(%arg0: i32, %arg1: memref<8x128xf32, #tpu.memory_space<vmem>>, %arg2: memref<16x8xf32, #tpu.memory_space<vmem>>, %arg3: memref<16x1xf32, #tpu.memory_space<vmem>>, %arg4: memref<16x16xf32, #tpu.memory_space<vmem>>, %arg5: memref<16x1xf32, #tpu.memory_space<vmem>>, %arg6: memref<1x16xf32, #tpu.memory_space<vmem>>, %arg7: memref<1x1xf32, #tpu.memory_space<vmem>>, %arg8: memref<1x128xf32, #tpu.memory_space<vmem>>) attributes {dimension_semantics = [#tpu.dimension_semantics<parallel>], iteration_bounds = array<i64: 1>, scalar_prefetch = 0 : i64, scratch_operands = 0 : i64, tpu.core_type = #tpu.core_type<tc>, window_params = [{transform_indices = @transform_0, window_bounds = array<i64: 8, 128>}, {pipeline_mode = #tpu.pipeline_mode<synchronous>, transform_indices = @transform_1, window_bounds = array<i64: 16, 8>}, {pipeline_mode = #tpu.pipeline_mode<synchronous>, transform_indices = @transform_2, window_bounds = array<i64: 16, 1>}, {pipeline_mode = #tpu.pipeline_mode<synchronous>, transform_indices = @transform_3, window_bounds = array<i64: 16, 16>}, {pipeline_mode = #tpu.pipeline_mode<synchronous>, transform_indices = @transform_4, window_bounds = array<i64: 16, 1>}, {pipeline_mode = #tpu.pipeline_mode<synchronous>, transform_indices = @transform_5, window_bounds = array<i64: 1, 16>}, {pipeline_mode = #tpu.pipeline_mode<synchronous>, transform_indices = @transform_6, window_bounds = array<i64: 1, 1>}, {transform_indices = @transform_7, window_bounds = array<i64: 1, 128>}]} {
    %c0 = arith.constant 0 : index
    %c0_0 = arith.constant 0 : index
    %0 = vector.load %arg1[%c0, %c0_0] : memref<8x128xf32, #tpu.memory_space<vmem>>, vector<8x128xf32>
    %c0_1 = arith.constant 0 : index
    %c0_2 = arith.constant 0 : index
    %1 = vector.load %arg2[%c0_1, %c0_2] : memref<16x8xf32, #tpu.memory_space<vmem>>, vector<16x8xf32>
    %cst = arith.constant dense<0.000000e+00> : vector<16x128xf32>
    %2 = tpu.matmul %1, %0, %cst {dimension_numbers = #tpu.dot_dimension_numbers<[1], [0], [0], [1], [0, 0, 1, 1], [], []>} : vector<16x8xf32>, vector<8x128xf32>, vector<16x128xf32> -> vector<16x128xf32>
    %c0_3 = arith.constant 0 : index
    %c0_4 = arith.constant 0 : index
    %3 = vector.load %arg3[%c0_3, %c0_4] : memref<16x1xf32, #tpu.memory_space<vmem>>, vector<16x1xf32>
    %4 = vector.broadcast %3 : vector<16x1xf32> to vector<16x128xf32>
    %5 = arith.addf %2, %4 : vector<16x128xf32>
    %cst_5 = arith.constant 0.000000e+00 : f32
    %6 = vector.broadcast %cst_5 : f32 to vector<16x128xf32>
    %7 = arith.maximumf %5, %6 : vector<16x128xf32>
    %c0_6 = arith.constant 0 : index
    %c0_7 = arith.constant 0 : index
    %8 = vector.load %arg4[%c0_6, %c0_7] : memref<16x16xf32, #tpu.memory_space<vmem>>, vector<16x16xf32>
    %cst_8 = arith.constant dense<0.000000e+00> : vector<16x128xf32>
    %9 = tpu.matmul %8, %7, %cst_8 {dimension_numbers = #tpu.dot_dimension_numbers<[1], [0], [0], [1], [0, 0, 1, 1], [], []>} : vector<16x16xf32>, vector<16x128xf32>, vector<16x128xf32> -> vector<16x128xf32>
    %c0_9 = arith.constant 0 : index
    %c0_10 = arith.constant 0 : index
    %10 = vector.load %arg5[%c0_9, %c0_10] : memref<16x1xf32, #tpu.memory_space<vmem>>, vector<16x1xf32>
    %11 = vector.broadcast %10 : vector<16x1xf32> to vector<16x128xf32>
    %12 = arith.addf %9, %11 : vector<16x128xf32>
    %cst_11 = arith.constant 0.000000e+00 : f32
    %13 = vector.broadcast %cst_11 : f32 to vector<16x128xf32>
    %14 = arith.maximumf %12, %13 : vector<16x128xf32>
    %c0_12 = arith.constant 0 : index
    %c0_13 = arith.constant 0 : index
    %15 = vector.load %arg6[%c0_12, %c0_13] : memref<1x16xf32, #tpu.memory_space<vmem>>, vector<1x16xf32>
    %cst_14 = arith.constant dense<0.000000e+00> : vector<1x128xf32>
    %16 = tpu.matmul %15, %14, %cst_14 {dimension_numbers = #tpu.dot_dimension_numbers<[1], [0], [0], [1], [0, 0, 1, 1], [], []>} : vector<1x16xf32>, vector<16x128xf32>, vector<1x128xf32> -> vector<1x128xf32>
    %c0_15 = arith.constant 0 : index
    %c0_16 = arith.constant 0 : index
    %17 = vector.load %arg7[%c0_15, %c0_16] : memref<1x1xf32, #tpu.memory_space<vmem>>, vector<1x1xf32>
    %18 = vector.broadcast %17 : vector<1x1xf32> to vector<1x128xf32>
    %19 = arith.addf %16, %18 : vector<1x128xf32>
    %c0_17 = arith.constant 0 : index
    %c0_18 = arith.constant 0 : index
    %20 = vector.load %arg8[%c0_17, %c0_18] : memref<1x128xf32, #tpu.memory_space<vmem>>, vector<1x128xf32>
    tpu.vector_store %arg8[%c0_17, %c0_18], %19 {strides = array<i32>} : memref<1x128xf32, #tpu.memory_space<vmem>>, vector<1x128xf32>,
    return
  }
  func.func @transform_0(%arg0: i32) -> (i32, i32) {
    %c0_i32 = arith.constant 0 : i32
    %c0_i32_0 = arith.constant 0 : i32
    return %c0_i32, %arg0 : i32, i32
  }
  func.func @transform_1(%arg0: i32) -> (i32, i32) {
    %c0_i32 = arith.constant 0 : i32
    %c0_i32_0 = arith.constant 0 : i32
    %c0_i32_1 = arith.constant 0 : i32
    return %c0_i32, %c0_i32_0 : i32, i32
  }
  func.func @transform_2(%arg0: i32) -> (i32, i32) {
    %c0_i32 = arith.constant 0 : i32
    %c0_i32_0 = arith.constant 0 : i32
    %c0_i32_1 = arith.constant 0 : i32
    return %c0_i32, %c0_i32_0 : i32, i32
  }
  func.func @transform_3(%arg0: i32) -> (i32, i32) {
    %c0_i32 = arith.constant 0 : i32
    %c0_i32_0 = arith.constant 0 : i32
    %c0_i32_1 = arith.constant 0 : i32
    return %c0_i32, %c0_i32_0 : i32, i32
  }
  func.func @transform_4(%arg0: i32) -> (i32, i32) {
    %c0_i32 = arith.constant 0 : i32
    %c0_i32_0 = arith.constant 0 : i32
    %c0_i32_1 = arith.constant 0 : i32
    return %c0_i32, %c0_i32_0 : i32, i32
  }
  func.func @transform_5(%arg0: i32) -> (i32, i32) {
    %c0_i32 = arith.constant 0 : i32
    %c0_i32_0 = arith.constant 0 : i32
    %c0_i32_1 = arith.constant 0 : i32
    return %c0_i32, %c0_i32_0 : i32, i32
  }
  func.func @transform_6(%arg0: i32) -> (i32, i32) {
    %c0_i32 = arith.constant 0 : i32
    %c0_i32_0 = arith.constant 0 : i32
    %c0_i32_1 = arith.constant 0 : i32
    return %c0_i32, %c0_i32_0 : i32, i32
  }
  func.func @transform_7(%arg0: i32) -> (i32, i32) {
    %c0_i32 = arith.constant 0 : i32
    %c0_i32_0 = arith.constant 0 : i32
    return %c0_i32, %arg0 : i32, i32
  }
}

</mosaic_0001>

<bundles_post_ra>
// kernel: tpu_custom_call.1
= control target key start
LH: loop header
LB: loop body
LE: loop exit
PB: predicated region body
PF: predicated region fallthrough
CT: control target
= control target key end

     0   :  { %s490_s0 = inlined_call_operand.vmem [shape: f32[8,128], index: 0, kind: input, shape index: {}]   ;;  %s491_s1 = inlined_call_operand.vmem [shape: f32[16,8], index: 1, kind: input, shape index: {}]   ;;  %s492_s2 = inlined_call_operand.vmem [shape: f32[16,1], index: 2, kind: input, shape index: {}]   ;;  %s493_s3 = inlined_call_operand.vmem [shape: f32[16,16], index: 3, kind: input, shape index: {}]   ;;  %s494_s4 = inlined_call_operand.vmem [shape: f32[16,1], index: 4, kind: input, shape index: {}]   ;;  %s495_s5 = inlined_call_operand.vmem [shape: f32[1,16], index: 5, kind: input, shape index: {}]   ;;  %s496_s6 = inlined_call_operand.<no memory space> [shape: f32[1,1], index: 6, kind: input, shape index: {}]   ;;  %s497_s7 = inlined_call_operand.hbm [shape: f32[1,128], index: 7, kind: output, shape index: {}]  }
   0x1   :  { %v12_v0 = vstv %s496_s6 }
   0x2   :  { %13 = vst [vmem:[#allocation2] sm:$0x1] %v12_v0 }
   0x3   :  { %v29_v1 = vld [vmem:[%s490_s0] sm:$0xff]  ;;  %vm44_vm0 = vcmask 64512   ;;  %v31_v3 = vld [vmem:[%s491_s1 + $0x8] sm:$0xff]  ;;  %v397_v5 = vmov 0  }
   0x4   :  { %v30_v2 = vld [vmem:[%s491_s1] sm:$0xff]  ;;  %340 = vmatprep.subr.mxu0 %v29_v1  ;;  %371 = vset.pattern.permute.xlu0 %v397_v5 }
   0x5   :  { %342 = vmatprep.mubr.msk.f32.mxu0 %vm44_vm0, %v30_v2  ;;  %v32_v4 = vld [vmem:[%s492_s2] sm:$0xff]  ;;  %341 = vmatpush3.msra.mxu0 %v29_v1 }
   0x6   :  { %14 = vsyncpa [#allocation4], 0  ;;  %343 = vmatmul.mubr.msk.f32.vlgmr.msra.gmra.mrb[0].mxu0 %vm44_vm0, %v31_v3  ;;  %36 = vperm.xlu0 %371, %v32_v4   ;;  %v33_v6 = vld [vmem:[%s492_s2 + $0x8] sm:$0xff]  ;;  %v128_v8 = vld [vmem:[%s493_s3] sm:$0xff]  ;;  %vm142_vm1 = vcmask 130048   ;;  %v398_v21 = vmov 0.0|0.0   ;;  %v233_v33 = vlaneseq }
   0x7   :  { %372 = vset.pattern.permute.xlu1 %v397_v5  ;;  %349 = vmatprep.mubr.msk.f32.mxu1 %vm142_vm1, %v128_v8  ;;  %v130_v9 = vld [vmem:[%s494_s4] sm:$0xff]  ;;  %v131_v10 = vld [vmem:[%s494_s4 + $0x8] sm:$0xff]  ;;  %vm399_vm2 = vmmov 0   ;;  %v400_v22 = vmov 0.0  }
   0x8   :  { %134 = vperm.xlu1 %372, %v130_v9   ;;  %v129_v20 = vld [vmem:[%s493_s3 + $0x8] sm:$0xff]  ;;  %363 = vmatprep.subr.bf16.mxu0 %v398_v21  ;;  %v226_v32 = vld [vmem:[%s495_s5] sm:$0x1]  ;;  %v234_v34 = vshrl.u32 %v233_v33, 7  ;;  %s401_s3 = smov [#allocation3]  }
   0x9   :  { %v227_v7 = vld [vmem:[#allocation2] sm:$0x1]  ;;  %356 = vmatprep.mubr.msk.f32.mxu0 %vm399_vm2, %v400_v22  ;;  %s317_s18 = sshll.u32 %s401_s3, 4  ;;  %s318_s18 = int_to_ptr.vmem [resolvable:$true] %s317_s18 }
   0xa   :  { %41 = vperm.xlu0 %371, %v33_v6   ;;  %v235_v35 = vsub.s32 0, %v234_v34  ;;  %s373_s19 = scalar_lea.vmem %s318_s18, 16  ;;  %s377_s20 = scalar_lea.vmem %s318_s18, 32 }
   0xb   :  { %p374_p0 = scmp.ne.s32.totalorder %s318_s18, %s373_s19  ;;  %p378_p1 = scmp.lt.s32.totalorder %s318_s18, %s318_s18 }
   0xc   :  { %139 = vperm.xlu1 %372, %v131_v10   ;;  %p379_p2 = scmp.lt.s32.totalorder %s377_s20, %s373_s19 }
   0xe   :  { %230 = vperm.xlu0 %371, %v227_v7   ;;  %p380_p3 = por %p379_p2, %p378_p1 }
  0x10   :  { %p381_p4 = pnand %p380_p3, %p374_p0 }
  0x85   :  { %v37_v11 = vpop.permute.xlu0 %36 }
  0x87   :  { %v135_v23 = vpop.permute.xlu1 %134 }
  0x89   :  { %v42_v12 = vpop.permute.xlu0 %41 }
  0x8b   :  { %v140_v24 = vpop.permute.xlu1 %139 }
  0x8d   :  { %v231_v36 = vpop.permute.xlu0 %230 }
  0x8e   :  { %v236_v37 = vrot.slane %v231_v36, %v235_v35 }
  0xd9   :  { %v344_v13 = vpop.f32.mrb[0].mxu0 }
  0xda   :  { %v123_v14 = vadd.f32 %v344_v13, %v42_v12  ;;  %v117_v15 = vpop.f32.mrb[1].mxu0 }
  0xdb   :  { %v118_v16 = vadd.f32 %v117_v15, %v37_v11 }
  0xdc   :  { %v127_v17 = vmax.f32 %v123_v14, 0.0 }
  0xdd   :  { %v126_v18 = vmax.f32 %v118_v16, 0.0 }
  0xdf   :  { %v359_v19 = vpack.c.bf16 %v127_v17, %v126_v18 }
  0xe1   :  { %360 = vmatprep.subr.bf16.mxu1 %v359_v19 }
  0xe2   :  { %362 = vmatpush3.bf16.msra.mxu1 %v359_v19 }
  0xe5   :  { %350 = vmatmul.mubr.msk.f32.vlgmr.msra.gmra.mrb[0].mxu1 %vm142_vm1, %v129_v20 }
 0x1b8   :  { %v351_v25 = vpop.f32.mrb[0].mxu1 }
 0x1b9   :  { %v221_v26 = vadd.f32 %v351_v25, %v140_v24  ;;  %v215_v27 = vpop.f32.mrb[1].mxu1 }
 0x1ba   :  { %v216_v28 = vadd.f32 %v215_v27, %v135_v23 }
 0x1bb   :  { %v225_v29 = vmax.f32 %v221_v26, 0.0 }
 0x1bc   :  { %v224_v30 = vmax.f32 %v216_v28, 0.0 }
 0x1be   :  { %v364_v31 = vpack.c.bf16 %v225_v29, %v224_v30 }
 0x1c0   :  { %365 = vmatpush3.bf16.msra.mxu0 %v364_v31 }
 0x1c3   :  { %357 = vmatmul.mubr.msk.f32.vlgmr.msra.gmra.mrb[2].mxu0 %vm142_vm1, %v226_v32 }
 0x296   :  { %v306_v38 = vpop.f32.mrb[2].mxu0 }
 0x297   :  { %v307_v39 = vadd.f32 %v306_v38, %v236_v37  ;;  %v358_v40 = vpop.f32.mrb[3].mxu0 }
 0x299   :  { %310 = vst [vmem:[#allocation3] sm:$0x1] %v307_v39 }
 0x29a   :  { %384 = shalt.err (!%p381_p4)
}
 0x29b   :  { %s385_s22 = scalar_lea.hbm %s497_s7, 16 }
 0x29c   :  { %p386_p5 = scmp.ne.s32.totalorder %s497_s7, %s385_s22  ;;  %p389_p6 = scmp.lt.u32.totalorder %s385_s22, %s497_s7 }
 0x29e   :  { %p391_p7 = pnand %p389_p6, %p386_p5 }
 0x2a0   :  { %394 = shalt.err (!%p391_p7)
}
 0x2a1   :  { %320 = dma.vmem_to_hbm [thread:$0]  %s318_s18, 16, %s497_s7, [#allocation4]  }
 0x2a2   :  { %395 = dma.done.wait [#allocation4], 16  }
 0x2a3   :  { %396 = vsyncadd [#allocation4], 4294967280 }
 0x2a4   :  { %324 = vsyncpa [#allocation4], 1 }

</bundles_post_ra>
